<compile_context>
chip_gen: v5e
topology: v5e:2x2
jax: 0.10.0
libtpu: 0.0.40
codegen_flags: <defaults>
</compile_context>

<pallas_src>
import functools

import jax
import jax.numpy as jnp
import numpy as np
from jax.experimental import pallas as pl
from jax.experimental.pallas import tpu as pltpu

LANE = 128


def _pad_cols(x, c_pad):
    c = x.shape[-1]
    if c == c_pad:
        return x
    pad = [(0, 0)] * (x.ndim - 1) + [(0, c_pad - c)]
    return jnp.pad(x, pad)


# --------------------------------------------------------------------------
# Branch B: streaming mean/max pooling over seq + Linear(2H -> C).
# --------------------------------------------------------------------------
def pool_linear_kernel(seq_ref, wa_ref, wm_ref, b_ref, out_ref,
                       sum_acc, max_acc, *, inv_s):
    s = pl.program_id(1)

    @pl.when(s == 0)
    def _init():
        sum_acc[...] = jnp.zeros_like(sum_acc)
        max_acc[...] = jnp.full_like(max_acc, -jnp.inf)

    # bf16 tile streamed from HBM; one upcast, f32 accumulation (v5e-safe).
    tile = seq_ref[...].astype(jnp.float32)              # [TB, TS, H]
    sum_acc[...] += jnp.sum(tile, axis=1)                # [TB, H]
    max_acc[...] = jnp.maximum(max_acc[...], jnp.max(tile, axis=1))

    @pl.when(s == pl.num_programs(1) - 1)
    def _finalize():
        apool = (sum_acc[...] * inv_s).astype(jnp.bfloat16)
        mpool = max_acc[...].astype(jnp.bfloat16)
        out_ref[...] = (
            jnp.dot(apool, wa_ref[...], preferred_element_type=jnp.float32)
            + jnp.dot(mpool, wm_ref[...], preferred_element_type=jnp.float32)
            + b_ref[...])


def head_pooled(seq_x, W, b, *, tb=8, ts=8):
    """seq_x: [B,S,H], W: [2H,C] f32, b: [C] f32 -> logits [B,C] f32."""
    B, S, H = seq_x.shape
    C = W.shape[1]
    assert B % tb == 0 and S % ts == 0, "demo wrapper requires exact tiling"
    c_pad = pl.cdiv(C, LANE) * LANE

    seq_bf16 = seq_x.astype(jnp.bfloat16)                # halve HBM traffic
    w_pad = _pad_cols(W, c_pad).astype(jnp.bfloat16)     # lane-dense output
    wa, wm = w_pad[:H], w_pad[H:]
    b_pad = _pad_cols(b.reshape(1, C), c_pad).astype(jnp.float32)

    out = pl.pallas_call(
        functools.partial(pool_linear_kernel, inv_s=float(1.0 / S)),
        out_shape=jax.ShapeDtypeStruct((B, c_pad), jnp.float32),
        grid_spec=pltpu.PrefetchScalarGridSpec(
            num_scalar_prefetch=0,
            grid=(B // tb, S // ts),
            in_specs=[
                pl.BlockSpec((tb, ts, H), lambda bi, si: (bi, si, 0)),
                pl.BlockSpec((H, c_pad), lambda bi, si: (0, 0)),
                pl.BlockSpec((H, c_pad), lambda bi, si: (0, 0)),
                pl.BlockSpec((1, c_pad), lambda bi, si: (0, 0)),
            ],
            out_specs=pl.BlockSpec((tb, c_pad), lambda bi, si: (bi, 0)),
            scratch_shapes=[pltpu.VMEM((tb, H), jnp.float32),   # running sum
                            pltpu.VMEM((tb, H), jnp.float32)],  # running max
        ),
        compiler_params=pltpu.CompilerParams(
            dimension_semantics=("parallel", "arbitrary")),
    )(seq_bf16, wa, wm, b_pad)
    return out[:, :C]


# --------------------------------------------------------------------------
# Branch A: softmax(layer_weights)-weighted sum of CLS vectors + Linear(H->C).
# CLS layout is [L, B, H] so H is lane-dense; softmax weights are scalars in
# SMEM; the reduction over L is an unrolled VPU multiply-add.
# --------------------------------------------------------------------------
def multisample_head_kernel(lw_ref, cls_ref, w_ref, b_ref, out_ref):
    num_layers = cls_ref.shape[0]
    acc = lw_ref[0] * cls_ref[0].astype(jnp.float32)     # [TB, H] f32
    for l in range(1, num_layers):                       # unrolled (L static)
        acc = acc + lw_ref[l] * cls_ref[l].astype(jnp.float32)
    cls_out = acc.astype(jnp.bfloat16)
    # mean of 5 identical linear(high_dropout(x)) passes == linear(x) in eval
    out_ref[...] = (jnp.dot(cls_out, w_ref[...],
                            preferred_element_type=jnp.float32)
                    + b_ref[...])


def head_multisample(cls_stack_lbh, layer_weights, W, b, *, tb=8):
    """cls_stack: [L,B,H], layer_weights: [L], W: [H,C], b: [C] -> [B,C]."""
    L, B, H = cls_stack_lbh.shape
    C = W.shape[1]
    assert B % tb == 0
    c_pad = pl.cdiv(C, LANE) * LANE

    sm = jax.nn.softmax(layer_weights.astype(jnp.float32), axis=0)  # [L]
    cls_bf16 = cls_stack_lbh.astype(jnp.bfloat16)
    w_pad = _pad_cols(W, c_pad).astype(jnp.bfloat16)
    b_pad = _pad_cols(b.reshape(1, C), c_pad).astype(jnp.float32)

    out = pl.pallas_call(
        multisample_head_kernel,
        out_shape=jax.ShapeDtypeStruct((B, c_pad), jnp.float32),
        grid_spec=pltpu.PrefetchScalarGridSpec(
            num_scalar_prefetch=0,
            grid=(B // tb,),
            in_specs=[
                pl.BlockSpec(memory_space=pltpu.MemorySpace.SMEM),  # sm scalars
                pl.BlockSpec((L, tb, H), lambda bi: (0, bi, 0)),
                pl.BlockSpec((H, c_pad), lambda bi: (0, 0)),
                pl.BlockSpec((1, c_pad), lambda bi: (0, 0)),
            ],
            out_specs=pl.BlockSpec((tb, c_pad), lambda bi: (bi, 0)),
        ),
        compiler_params=pltpu.CompilerParams(
            dimension_semantics=("parallel",)),
    )(sm, cls_bf16, w_pad, b_pad)
    return out[:, :C]


# --------------------------------------------------------------------------
# Pure-JAX references (mirror the torch forward, eval-mode dropout, same
# bf16-activation / f32-accumulate numerics as the kernels).
# --------------------------------------------------------------------------
def ref_pooled(seq_x_bf16, W, b):
    x = seq_x_bf16.astype(jnp.float32)
    apool = jnp.mean(x, axis=1)
    mpool = jnp.max(x, axis=1)
    feats = jnp.concatenate([apool, mpool], axis=1).astype(jnp.bfloat16)
    return jnp.dot(feats, W.astype(jnp.bfloat16),
                   preferred_element_type=jnp.float32) + b


def ref_multisample(cls_lbh_bf16, layer_weights, W, b):
    sm = jax.nn.softmax(layer_weights.astype(jnp.float32), axis=0)    # [L]
    cls = cls_lbh_bf16.astype(jnp.float32)
    cls_out = jnp.sum(sm[:, None, None] * cls, axis=0)                # [B,H]
    return jnp.dot(cls_out.astype(jnp.bfloat16), W.astype(jnp.bfloat16),
                   preferred_element_type=jnp.float32) + b


if __name__ == "__main__":
    key = jax.random.PRNGKey(0)
    k_emb, k_ids, k_w2, k_b2, k_w1, k_b1 = jax.random.split(key, 6)

    # Small shapes chosen so the (8,128)-aligned tiled grid is exercised.
    bs, seq_len, hidden, num_classes = 16, 32, 128, 2
    num_hidden_layers = 3                       # n_weights = 4
    vocab = 50

    # Module inputs (as in forward(input_ids, attention_masks)).
    input_ids = jax.random.randint(k_ids, (bs, seq_len), 0, vocab)
    # attention_masks is consumed only by the backbone; the torch head pools
    # the raw last_hidden_state unmasked, and the kernels do the same.
    attention_masks = jnp.ones((bs, seq_len), jnp.int32)

    # Synthetic deterministic "backbone" (glue, not the kernel hot path).
    emb_table = jax.random.normal(k_emb, (vocab, hidden), jnp.float32)
    seq_x = emb_table[input_ids]                                     # [B,S,H]
    hidden_layers = [seq_x * (0.5 + 0.1 * l) + 0.01 * l
                     for l in range(num_hidden_layers + 1)]          # L x [B,S,H]

    # --- Branch B params: Linear(2*hidden -> num_classes) -----------------
    W_pool = 0.02 * jax.random.normal(k_w2, (2 * hidden, num_classes), jnp.float32)
    b_pool = 0.02 * jax.random.normal(k_b2, (num_classes,), jnp.float32)

    out_pool = jax.block_until_ready(head_pooled(seq_x, W_pool, b_pool))
    ref_pool = ref_pooled(seq_x.astype(jnp.bfloat16), W_pool, b_pool)
    np.testing.assert_allclose(np.asarray(out_pool), np.asarray(ref_pool),
                               rtol=1e-3, atol=5e-4)

    # --- Branch A params: layer_weights + Linear(hidden -> num_classes) ---
    n_weights = num_hidden_layers + 1
    layer_weights = jnp.zeros((n_weights,), jnp.float32).at[:-1].set(-3.0)
    W_cls = 0.02 * jax.random.normal(k_w1, (hidden, num_classes), jnp.float32)
    b_cls = 0.02 * jax.random.normal(k_b1, (num_classes,), jnp.float32)

    # Lane-dense layout: stack CLS vectors along a leading layer axis [L,B,H]
    # (equivalent to torch.stack(..., dim=2) up to layout).
    cls_stack = jnp.stack([h[:, 0, :] for h in hidden_layers], axis=0)

    out_ms = jax.block_until_ready(
        head_multisample(cls_stack, layer_weights, W_cls, b_cls))
    ref_ms = ref_multisample(cls_stack.astype(jnp.bfloat16),
                             layer_weights, W_cls, b_cls)
    np.testing.assert_allclose(np.asarray(out_ms), np.asarray(ref_ms),
                               rtol=1e-3, atol=5e-4)

    print("KERNEL_OK")
</pallas_src>

<mosaic_0001>
module attributes {stable_mosaic.version = 11 : i64} {
  func.func @pool_linear_kernel(%arg0: i32, %arg1: i32, %arg2: memref<8x8x128xbf16, #tpu.memory_space<vmem>>, %arg3: memref<128x128xbf16, #tpu.memory_space<vmem>>, %arg4: memref<128x128xbf16, #tpu.memory_space<vmem>>, %arg5: memref<1x128xf32, #tpu.memory_space<vmem>>, %arg6: memref<8x128xf32, #tpu.memory_space<vmem>>, %arg7: memref<8x128xf32, #tpu.memory_space<vmem>>, %arg8: memref<8x128xf32, #tpu.memory_space<vmem>>) attributes {dimension_semantics = [#tpu.dimension_semantics<parallel>, #tpu.dimension_semantics<arbitrary>], iteration_bounds = array<i64: 2, 4>, scalar_prefetch = 0 : i64, scratch_operands = 2 : i64, tpu.core_type = #tpu.core_type<tc>, window_params = [{transform_indices = @transform_0, window_bounds = array<i64: 8, 8, 128>}, {pipeline_mode = #tpu.pipeline_mode<synchronous>, transform_indices = @transform_1, window_bounds = array<i64: 128, 128>}, {pipeline_mode = #tpu.pipeline_mode<synchronous>, transform_indices = @transform_2, window_bounds = array<i64: 128, 128>}, {pipeline_mode = #tpu.pipeline_mode<synchronous>, transform_indices = @transform_3, window_bounds = array<i64: 1, 128>}, {transform_indices = @transform_4, window_bounds = array<i64: 8, 128>}]} {
    %c0_i32 = arith.constant 0 : i32
    %0 = arith.cmpi eq, %arg1, %c0_i32 : i32
    %1 = arith.extui %0 : i1 to i32
    %c0_i32_0 = arith.constant 0 : i32
    %2 = arith.cmpi ne, %1, %c0_i32_0 : i32
    scf.if %2 {
      %cst_13 = arith.constant 0.000000e+00 : f32
      %16 = vector.broadcast %cst_13 : f32 to vector<8x128xf32>
      %c0_14 = arith.constant 0 : index
      %c0_15 = arith.constant 0 : index
      %17 = vector.load %arg7[%c0_14, %c0_15] : memref<8x128xf32, #tpu.memory_space<vmem>>, vector<8x128xf32>
      tpu.vector_store %arg7[%c0_14, %c0_15], %16 {strides = array<i32>} : memref<8x128xf32, #tpu.memory_space<vmem>>, vector<8x128xf32>,
      %cst_16 = arith.constant 0xFF800000 : f32
      %18 = vector.broadcast %cst_16 : f32 to vector<8x128xf32>
      %c0_17 = arith.constant 0 : index
      %c0_18 = arith.constant 0 : index
      %19 = vector.load %arg8[%c0_17, %c0_18] : memref<8x128xf32, #tpu.memory_space<vmem>>, vector<8x128xf32>
      tpu.vector_store %arg8[%c0_17, %c0_18], %18 {strides = array<i32>} : memref<8x128xf32, #tpu.memory_space<vmem>>, vector<8x128xf32>,
    } else {
    }
    %c0 = arith.constant 0 : index
    %c0_1 = arith.constant 0 : index
    %c0_2 = arith.constant 0 : index
    %3 = vector.load %arg2[%c0, %c0_1, %c0_2] : memref<8x8x128xbf16, #tpu.memory_space<vmem>>, vector<8x8x128xbf16>
    %4 = arith.extf %3 : vector<8x8x128xbf16> to vector<8x8x128xf32>
    %c0_3 = arith.constant 0 : index
    %c0_4 = arith.constant 0 : index
    %5 = vector.load %arg7[%c0_3, %c0_4] : memref<8x128xf32, #tpu.memory_space<vmem>>, vector<8x128xf32>
    %cst = arith.constant dense<0.000000e+00> : vector<8x128xf32>
    %6 = vector.multi_reduction <add>, %4, %cst [1] : vector<8x8x128xf32> to vector<8x128xf32>
    %7 = arith.addf %5, %6 : vector<8x128xf32>
    %c0_5 = arith.constant 0 : index
    %c0_6 = arith.constant 0 : index
    %8 = vector.load %arg7[%c0_5, %c0_6] : memref<8x128xf32, #tpu.memory_space<vmem>>, vector<8x128xf32>
    tpu.vector_store %arg7[%c0_5, %c0_6], %7 {strides = array<i32>} : memref<8x128xf32, #tpu.memory_space<vmem>>, vector<8x128xf32>,
    %c0_7 = arith.constant 0 : index
    %c0_8 = arith.constant 0 : index
    %9 = vector.load %arg8[%c0_7, %c0_8] : memref<8x128xf32, #tpu.memory_space<vmem>>, vector<8x128xf32>
    %cst_9 = arith.constant dense<0xFF800000> : vector<8x128xf32>
    %10 = vector.multi_reduction <maximumf>, %4, %cst_9 [1] : vector<8x8x128xf32> to vector<8x128xf32>
    %11 = arith.maximumf %9, %10 : vector<8x128xf32>
    %c0_10 = arith.constant 0 : index
    %c0_11 = arith.constant 0 : index
    %12 = vector.load %arg8[%c0_10, %c0_11] : memref<8x128xf32, #tpu.memory_space<vmem>>, vector<8x128xf32>
    tpu.vector_store %arg8[%c0_10, %c0_11], %11 {strides = array<i32>} : memref<8x128xf32, #tpu.memory_space<vmem>>, vector<8x128xf32>,
    %c3_i32 = arith.constant 3 : i32
    %13 = arith.cmpi eq, %arg1, %c3_i32 : i32
    %14 = arith.extui %13 : i1 to i32
    %c0_i32_12 = arith.constant 0 : i32
    %15 = arith.cmpi ne, %14, %c0_i32_12 : i32
    scf.if %15 {
      %c0_13 = arith.constant 0 : index
      %c0_14 = arith.constant 0 : index
      %16 = vector.load %arg7[%c0_13, %c0_14] : memref<8x128xf32, #tpu.memory_space<vmem>>, vector<8x128xf32>
      %cst_15 = arith.constant 3.125000e-02 : f32
      %17 = vector.broadcast %cst_15 : f32 to vector<8x128xf32>
      %18 = arith.mulf %16, %17 : vector<8x128xf32>
      %19 = arith.truncf %18 : vector<8x128xf32> to vector<8x128xbf16>
      %c0_16 = arith.constant 0 : index
      %c0_17 = arith.constant 0 : index
      %20 = vector.load %arg8[%c0_16, %c0_17] : memref<8x128xf32, #tpu.memory_space<vmem>>, vector<8x128xf32>
      %21 = arith.truncf %20 : vector<8x128xf32> to vector<8x128xbf16>
      %c0_18 = arith.constant 0 : index
      %c0_19 = arith.constant 0 : index
      %22 = vector.load %arg3[%c0_18, %c0_19] : memref<128x128xbf16, #tpu.memory_space<vmem>>, vector<128x128xbf16>
      %cst_20 = arith.constant dense<0.000000e+00> : vector<8x128xf32>
      %23 = tpu.matmul %19, %22, %cst_20 {dimension_numbers = #tpu.dot_dimension_numbers<[1], [0], [0], [1], [0, 0, 1, 1], [], []>} : vector<8x128xbf16>, vector<128x128xbf16>, vector<8x128xf32> -> vector<8x128xf32>
      %c0_21 = arith.constant 0 : index
      %c0_22 = arith.constant 0 : index
      %24 = vector.load %arg4[%c0_21, %c0_22] : memref<128x128xbf16, #tpu.memory_space<vmem>>, vector<128x128xbf16>
      %cst_23 = arith.constant dense<0.000000e+00> : vector<8x128xf32>
      %25 = tpu.matmul %21, %24, %cst_23 {dimension_numbers = #tpu.dot_dimension_numbers<[1], [0], [0], [1], [0, 0, 1, 1], [], []>} : vector<8x128xbf16>, vector<128x128xbf16>, vector<8x128xf32> -> vector<8x128xf32>
      %26 = arith.addf %23, %25 : vector<8x128xf32>
      %c0_24 = arith.constant 0 : index
      %c0_25 = arith.constant 0 : index
      %27 = vector.load %arg5[%c0_24, %c0_25] : memref<1x128xf32, #tpu.memory_space<vmem>>, vector<1x128xf32>
      %28 = vector.broadcast %27 : vector<1x128xf32> to vector<8x128xf32>
      %29 = arith.addf %26, %28 : vector<8x128xf32>
      %c0_26 = arith.constant 0 : index
      %c0_27 = arith.constant 0 : index
      %30 = vector.load %arg6[%c0_26, %c0_27] : memref<8x128xf32, #tpu.memory_space<vmem>>, vector<8x128xf32>
      tpu.vector_store %arg6[%c0_26, %c0_27], %29 {strides = array<i32>} : memref<8x128xf32, #tpu.memory_space<vmem>>, vector<8x128xf32>,
    } else {
    }
    return
  }
  func.func @transform_0(%arg0: i32, %arg1: i32) -> (i32, i32, i32) {
    %c0_i32 = arith.constant 0 : i32
    %c0_i32_0 = arith.constant 0 : i32
    return %arg0, %arg1, %c0_i32 : i32, i32, i32
  }
  func.func @transform_1(%arg0: i32, %arg1: i32) -> (i32, i32) {
    %c0_i32 = arith.constant 0 : i32
    %c0_i32_0 = arith.constant 0 : i32
    %c0_i32_1 = arith.constant 0 : i32
    return %c0_i32, %c0_i32_0 : i32, i32
  }
  func.func @transform_2(%arg0: i32, %arg1: i32) -> (i32, i32) {
    %c0_i32 = arith.constant 0 : i32
    %c0_i32_0 = arith.constant 0 : i32
    %c0_i32_1 = arith.constant 0 : i32
    return %c0_i32, %c0_i32_0 : i32, i32
  }
  func.func @transform_3(%arg0: i32, %arg1: i32) -> (i32, i32) {
    %c0_i32 = arith.constant 0 : i32
    %c0_i32_0 = arith.constant 0 : i32
    %c0_i32_1 = arith.constant 0 : i32
    return %c0_i32, %c0_i32_0 : i32, i32
  }
  func.func @transform_4(%arg0: i32, %arg1: i32) -> (i32, i32) {
    %c0_i32 = arith.constant 0 : i32
    %c0_i32_0 = arith.constant 0 : i32
    return %arg0, %c0_i32 : i32, i32
  }
}

</mosaic_0001>

<bundles_post_ra>
// kernel: tpu_custom_call.1
= control target key start
LH: loop header
LB: loop body
LE: loop exit
PB: predicated region body
PF: predicated region fallthrough
CT: control target
= control target key end

     0   :  { %s1498_s0 = inlined_call_operand.hbm [shape: bf16[16,32,128], index: 0, kind: input, shape index: {}]   ;;  %s1499_s1 = inlined_call_operand.hbm [shape: bf16[128,128], index: 1, kind: input, shape index: {}]   ;;  %s1500_s2 = inlined_call_operand.hbm [shape: bf16[128,128], index: 2, kind: input, shape index: {}]   ;;  %s1501_s3 = inlined_call_operand.vmem [shape: f32[1,128], index: 3, kind: input, shape index: {}]   ;;  %s1502_s4 = inlined_call_operand.hbm [shape: f32[16,128], index: 4, kind: output, shape index: {}]  }
   0x1   :  { %1511 = sst [smem:[#allocation20_spill]] %s1499_s1 }
   0x2   :  { %1512 = sst [smem:[#allocation21_spill]] %s1500_s2 }
   0x3   :  { %1513 = sst [smem:[#allocation22_spill]] %s1501_s3 }
   0x4   :  { %1514 = sst [smem:[#allocation23_spill]] %s1502_s4 }
   0x5   :  { %9 = vsyncpa [#allocation5], 0 }
   0x6   :  { %11 = vsyncpa [#allocation5 + $0x1], 0 }
   0x7   :  { %12 = vsyncpa [#allocation8], 0 }
   0x8   :  { %13 = vsyncpa [#allocation6], 0 }
   0x9   :  { %15 = vsyncpa [#allocation6 + $0x1], 0  ;;  %s1218_s15 = smov 0   ;;  %s1220_s16 = smov 0  }
   0xa   :  { %s1222_s17 = smov 0   ;;  %s1224_s18 = smov 0  }
   0xb   :  { %s1226_s19 = smov 0   ;;  %s1228_s20 = smov 0  }
   0xc   :  { %s1230_s21 = smov 0   ;;  %s1232_s22 = smov 0  }
   0xd   :  { %s1234_s23 = smov 0   ;;  %s1236_s24 = smov 0  }
   0xe   :  { %s1238_s25 = smov 0  }
   0xf LB: > { %1515 = sst [smem:[#allocation14_spill]] %s1144_s15  ;;  %s718_s26 = sadd.s32 4294967295, %s1184_s25   ;;  %s1184_s25 = sphi %s1238_s25, %s21_s25   ;;  %s1180_s24 = sphi %s1236_s24, %s1549_s24   ;;  %s1176_s23 = sphi %s1234_s23, %s1548_s23   ;;  %s1172_s22 = sphi %s1232_s22, %s1547_s22   ;;  %s1168_s21 = sphi %s1230_s21, %s1546_s21   ;;  %s1164_s20 = sphi %s1228_s20, %s1545_s20   ;;  %s1160_s19 = sphi %s1226_s19, %s1544_s19   ;;  %s1156_s18 = sphi %s1224_s18, %s1543_s18   ;;  %s1152_s17 = sphi %s1222_s17, %s1542_s17   ;;  %s1148_s16 = sphi %s1220_s16, %s1541_s16   ;;  %s1144_s15 = sphi %s1218_s15, %s1540_s15  }
  0x10   : > { %1516 = sst [smem:[#allocation15_spill]] %s1168_s21  ;;  %s719_s27 = sadd.s32 4294967294, %s1184_s25  }
  0x11   : > { %1517 = sst [smem:[#allocation16_spill]] %s1172_s22  ;;  %p55_p0 = scmp.ne.s32.totalorder %s1160_s19, %s1156_s18 }
  0x12   : > { %p1274_p1 = scmp.eq.s32.totalorder %s718_s26, 0  ;;  %p141_p2 = scmp.ne.s32.totalorder %s1152_s17, %s1148_s16 }
  0x13   : > { %p142_p3 = scmp.eq.s32.totalorder %s718_s26, 7  ;;  %p147_p5 = scmp.ne.s32.totalorder %s1148_s16, %s1144_s15 }
  0x14   : > { %p1282_p4 = por %p1274_p1, %p55_p0  ;;  %p148_p7 = scmp.eq.s32.totalorder %s719_s27, 7 }
  0x15   : > { %p1288_p6 = por %p142_p3, %p141_p2  ;;  %p720_p8 = scmp.ge.s32.totalorder %s1184_s25, 1 }
  0x16   : > { %p155_p9 = scmp.lt.s32.totalorder %s1184_s25, 9  ;;  %p1294_p10 = por %p148_p7, %p147_p5 }
  0x17   : > { %s1520_s30 = scalar_select %p1288_p6, 1, 0 }
  0x18   : > { %s1522_s5 = scalar_select %p1294_p10, 1, 0 }
  0x19   : > { %1521 = sst [smem:[#allocation17_spill]] %s1520_s30  ;;  %p1298_p11 = pnand %p720_p8, %p155_p9 }
  0x1a   : > { %1523 = sst [smem:[#allocation18_spill]] %s1522_s5  ;;  %s1186_s10 = smov [#allocation7]  }
  0x1b   : > { %s1525_s1 = sld [smem:[#allocation20_spill]]  ;;  %p851_p12 = pneg %p1298_p11 }
  0x1c   : > { %s168_s11 = sshll.u32 %s1186_s10, 4  ;;  %s1526_s2 = sld [smem:[#allocation21_spill]]  ;;  %s169_s11 = int_to_ptr.vmem [resolvable:$true] %s168_s11 }
  0x1d   : > { %p852_p13 = pnand %p851_p12, %p1274_p1  ;;  %s1503_s18 = smov 64  }
  0x1e   : > { %s1504_s26 = smov 4   ;;  %s1189_s27 = smov [#allocation9]  }
  0x1f   : > { %s182_s7 = sshll.u32 %s1189_s27, 4  ;;  %s30_s8 = sadd.s32 1, %s1176_s23  ;;  %s183_s7 = int_to_ptr.vmem [resolvable:$true] %s182_s7 }
  0x20   : > { %p31_p0 = scmp.ge.s32.totalorder %s30_s8, 4  ;;  %s33_s10 = sadd.s32 1, %s1180_s24 }
  0x21   : > { %s166_s9 = sshll.u32 %s1525_s1, 4  ;;  %s42_s12 = sadd.s32 1, %s1164_s20  ;;  %s167_s9 = int_to_ptr.hbm [resolvable:$true] %s166_s9 }
  0x22   : > { %s180_s14 = sshll.u32 %s1526_s2, 4  ;;  %p49_p2 = scmp.ne.s32.totalorder %s1164_s20, %s1160_s19  ;;  %s181_s14 = int_to_ptr.hbm [resolvable:$true] %s180_s14 }
  0x23   : > { %854 = dma.hbm_to_vmem [thread:$0]  (!%p852_p13), %s167_s9, 1024, %s169_s11, [#allocation8], %s1503_s18, %s1503_s18, %s1504_s26  }
  0x24   : > { %857 = dma.hbm_to_vmem [thread:$0]  (!%p852_p13), %s181_s14, 1024, %s183_s7, [#allocation8], %s1503_s18, %s1503_s18, %s1504_s26  }
  0x25   : > { %s1551_s8 = smov (%p31_p0, %s30_s8), 0  ;;  %s1553_s10 = smov (!%p31_p0, %s33_s10), %s1180_s24 }
  0x26   : > { %1527 = sst [smem:[#allocation19_spill]] %s1551_s8  ;;  %s38_s9 = ssub.s32 %s1176_s23, %s1551_s8 }
  0x27   : > { %p50_p3 = scmp.eq.s32.totalorder %s1184_s25, 0  ;;  %p35_p5 = scmp.ge.s32.totalorder %s1553_s10, 2 }
  0x28   : > { %s131_s11 = sadd.s32 1, %s1152_s17  ;;  %p868_p8 = scmp.lt.s32.totalorder %s1184_s25, 8 }
  0x29   : > { %p1330_p7 = por %p50_p3, %p49_p2  ;;  %s1555_s10 = smov (%p35_p5, %s1553_s10), 0 }
  0x2a   : > { %s199_s14 = sand.u32 1, %s1164_s20   ;;  %s803_s27 = sshll.u32 %s1180_s24, 5 }
  0x2b   : > { %s37_s7 = ssub.s32 %s1180_s24, %s1555_s10  ;;  %s724_s26 = sshll.u32 %s199_s14, 5 }
  0x2c   : > { %s39_s18 = sor.u32 %s38_s9, %s37_s7  ;;  %p129_p9 = scmp.eq.s32.totalorder %s37_s7, 0 }
  0x2d   : > { %p40_p12 = scmp.eq.s32.totalorder %s39_s18, 0  ;;  %s208_s8 = sadd.s32 %s1176_s23, %s803_s27 }
  0x2e   : > { %s1342_s1 = scalar_select %p129_p9, %s1152_s17, %s131_s11  }
  0x2f   : > { %s1345_s2 = scalar_select %p40_p12, %s1164_s20, %s42_s12  }
  0x30   : > { %s727_s5 = sshll.u32 %s208_s8, 2  ;;  %s203_s15 = scalar_lea.vmem [#allocation4], %s724_s26 }
  0x31   : > { %s213_s4 = sshll.u32 %s203_s15, 4  ;;  %s210_s3 = scalar_lea.hbm %s1498_s0, %s727_s5  ;;  %s214_s4 = int_to_ptr.vmem [resolvable:$true] %s213_s4 }
  0x32   : > { %s211_s21 = sshll.u32 %s210_s3, 4  ;;  %p859_p13 = pnand %p868_p8, %p1330_p7  ;;  %s212_s21 = int_to_ptr.hbm [resolvable:$true] %s211_s21 }
  0x33   : > { %s200_s18 = scalar_lea.sflag [#allocation5], %s199_s14  ;;  %s1190_s9 = smov 256  }
  0x34   : > { %s1529_s11 = smov 4   ;;  %s1530_s7 = smov 64  }
  0x35   : > { %861 = dma.hbm_to_vmem [thread:$0]  (!%p859_p13), %s212_s21, 512, %s214_s4, %s200_s18, %s1190_s9, %s1530_s7, %s1529_s11  }
  0x36   : > { %225 = sbr.rel (%p1298_p11) target bundleno = 304 (0x130), region = 36  ;;  %s227_s15 = sand.u32 (!%p1298_p11), 1, %s1160_s19  }
  0x37   : > { %s729_s26 = sshll.u32 (!%p1298_p11), %s227_s15, 5  ;;  %s228_s22 = scalar_lea.sflag (!%p1298_p11), [#allocation5], %s227_s15 }
  0x38   : > { %s231_s30 = scalar_lea.vmem (!%p1298_p11), [#allocation4], %s729_s26 }
  0x3b   : > { %1131 = dma.done.wait (%p1282_p4), %s228_s22, 512  }
  0x3c   : > { %1133 = vsyncadd (%p1282_p4), %s228_s22, 4294966784 }
  0x3d   : > { %1135 = dma.done.wait (%p1274_p1), [#allocation8], 2048  }
  0x3e   : > { %1137 = vsyncadd (%p1274_p1), [#allocation8], 4294965248  ;;  %s264_s3 = sand.u32 1, %s1148_s16   ;;  %s1531_s5 = sld [smem:[#allocation15_spill]] }
  0x3f   : > { %s1371_s4 = sshll.u32 %s264_s3, 3 }
  0x40   : > { %s266_s21 = scalar_lea.vmem [#allocation10], %s1371_s4 }
  0x44   : > { %p733_p11 = scmp.ne.s32.totalorder %s1531_s5, 0 }
  0x46   : > { %271 = sbr.rel (%p733_p11) target bundleno = 78 (0x4e), region = 52 }
  0x4b   : > { %v1191_v0 = vmov 0.0   ;;  %v1192_v1 = vmov -inf  }
  0x4c   : > { %272 = vst [vmem:[#allocation2] sm:$0xff] %v1191_v0 }
  0x4d   : > { %273 = vst [vmem:[#allocation3] sm:$0xff] %v1192_v1 }
  0x4e PF: > { %v821_v2 = vld [vmem:[%s231_s30] sm:$0xff]   ;;  %v836_v3 = vld [vmem:[%s231_s30 + $0x8] sm:$0xff]   ;;  %v837_v4 = vld [vmem:[%s231_s30 + $0x10] sm:$0xff]   ;;  %vm347_vm0 = vcmask 1041409   ;;  %vm349_vm1 = vcmask 1042434   ;;  %vm351_vm2 = vcmask 1043459  }
  0x4f   : > { %v1375_v5 = vunpack.c.l.bf16 %v821_v2  ;;  %v1377_v6 = vunpack.c.h.bf16 %v821_v2  ;;  %v1379_v7 = vunpack.c.l.bf16 %v836_v3  ;;  %v1381_v8 = vunpack.c.h.bf16 %v836_v3  ;;  %v838_v9 = vld [vmem:[%s231_s30 + $0x18] sm:$0xff]   ;;  %s1532_s28 = sld [smem:[#allocation15_spill]] }
  0x50   : > { %v1383_v10 = vunpack.c.l.bf16 %v837_v4  ;;  %v1385_v11 = vunpack.c.h.bf16 %v837_v4  ;;  %v1387_v12 = vunpack.c.l.bf16 %v838_v9  ;;  %v1389_v13 = vunpack.c.h.bf16 %v838_v9 }
  0x51   : > { %v291_v14 = vrot.slane %v1375_v5, 4  ;;  %v297_v15 = vrot.slane %v1377_v6, 4  ;;  %v303_v16 = vrot.slane %v1379_v7, 4  ;;  %v309_v17 = vrot.slane %v1381_v8, 4 }
  0x52   : > { %v315_v18 = vrot.slane %v1383_v10, 4  ;;  %v321_v19 = vrot.slane %v1385_v11, 4  ;;  %v327_v20 = vrot.slane %v1387_v12, 4  ;;  %v333_v21 = vrot.slane %v1389_v13, 4 }
  0x53   : > { %v292_v22 = vadd.f32 %v1375_v5, %v291_v14  ;;  %v298_v23 = vadd.f32 %v1377_v6, %v297_v15  ;;  %v304_v24 = vadd.f32 %v1379_v7, %v303_v16  ;;  %v310_v25 = vadd.f32 %v1381_v8, %v309_v17 }
  0x54   : > { %v316_v26 = vadd.f32 %v1383_v10, %v315_v18  ;;  %v322_v27 = vadd.f32 %v1385_v11, %v321_v19  ;;  %v328_v28 = vadd.f32 %v1387_v12, %v327_v20  ;;  %v334_v29 = vadd.f32 %v1389_v13, %v333_v21 }
  0x55   : > { %v293_v30 = vrot.slane %v292_v22, 2  ;;  %v299_v31 = vrot.slane %v298_v23, 2  ;;  %v305_v32 = vrot.slane %v304_v24, 2  ;;  %v311_v33 = vrot.slane %v310_v25, 2  ;;  %p734_p1 = scmp.ne.s32.totalorder %s1532_s28, 3 }
  0x56   : > { %v317_v34 = vrot.slane %v316_v26, 2  ;;  %v323_v35 = vrot.slane %v322_v27, 2  ;;  %v329_v36 = vrot.slane %v328_v28, 2  ;;  %v335_v37 = vrot.slane %v334_v29, 2  ;;  %s1533_s8 = sld [smem:[#allocation22_spill]] (!%p734_p1) }
  0x57   : > { %v294_v38 = vadd.f32 %v293_v30, %v292_v22  ;;  %v300_v39 = vadd.f32 %v299_v31, %v298_v23  ;;  %v306_v40 = vadd.f32 %v305_v32, %v304_v24  ;;  %v312_v41 = vadd.f32 %v311_v33, %v310_v25 }
  0x58   : > { %v318_v42 = vadd.f32 %v317_v34, %v316_v26  ;;  %v324_v43 = vadd.f32 %v323_v35, %v322_v27  ;;  %v330_v44 = vadd.f32 %v329_v36, %v328_v28  ;;  %v336_v45 = vadd.f32 %v335_v37, %v334_v29  ;;  %v290_v26 = vld [vmem:[#allocation2] sm:$0xff] }
  0x59   : > { %v295_v46 = vrot.slane %v294_v38, 1  ;;  %v301_v47 = vrot.slane %v300_v39, 1  ;;  %v307_v48 = vrot.slane %v306_v40, 1  ;;  %v313_v49 = vrot.slane %v312_v41, 1 }
  0x5a   : > { %v319_v50 = vrot.slane %v318_v42, 1  ;;  %v325_v51 = vrot.slane %v324_v43, 1  ;;  %v331_v52 = vrot.slane %v330_v44, 1  ;;  %v337_v53 = vrot.slane %v336_v45, 1 }
  0x5b   : > { %v296_v54 = vadd.f32 %v295_v46, %v294_v38  ;;  %v302_v55 = vadd.f32 %v301_v47, %v300_v39  ;;  %v308_v56 = vadd.f32 %v307_v48, %v306_v40  ;;  %v314_v57 = vadd.f32 %v313_v49, %v312_v41 }
  0x5c   : > { %v320_v58 = vadd.f32 %v319_v50, %v318_v42  ;;  %v326_v59 = vadd.f32 %v325_v51, %v324_v43  ;;  %v332_v60 = vadd.f32 %v331_v52, %v330_v44  ;;  %v338_v61 = vadd.f32 %v337_v53, %v336_v45  ;;  %v364_v51 = vld [vmem:[#allocation3] sm:$0xff] }
  0x5d   : > { %v348_v62 = vsel %vm347_vm0, %v302_v55, %v296_v54  ;;  %vm353_vm3 = vcmask 1044484   ;;  %vm355_vm4 = vcmask 1045509   ;;  %vm357_vm5 = vcmask 1046534  }
  0x5e   : > { %v350_v63 = vsel %vm349_vm1, %v308_v56, %v348_v62  ;;  %vm359_vm6 = vcmask 1047559   ;;  %v366_v0 = vmax.f32 %v1375_v5, %v291_v14  ;;  %v372_v1 = vmax.f32 %v1377_v6, %v297_v15 }
  0x5f   : > { %v352_v2 = vsel %vm351_vm2, %v314_v57, %v350_v63  ;;  %v378_v3 = vmax.f32 %v1379_v7, %v303_v16  ;;  %v384_v4 = vmax.f32 %v1381_v8, %v309_v17  ;;  %v390_v9 = vmax.f32 %v1383_v10, %v315_v18 }
  0x60   : > { %v354_v22 = vsel %vm353_vm3, %v320_v58, %v352_v2  ;;  %v367_v23 = vrot.slane %v366_v0, 2  ;;  %v373_v24 = vrot.slane %v372_v1, 2  ;;  %v396_v25 = vmax.f32 %v1385_v11, %v321_v19 }
  0x61   : > { %v356_v27 = vsel %vm355_vm4, %v326_v59, %v354_v22  ;;  %v379_v5 = vrot.slane %v378_v3, 2  ;;  %v385_v14 = vrot.slane %v384_v4, 2  ;;  %v391_v6 = vrot.slane %v390_v9, 2 }
  0x62   : > { %v358_v15 = vsel %vm357_vm5, %v332_v60, %v356_v27  ;;  %v368_v28 = vmax.f32 %v366_v0, %v367_v23  ;;  %v374_v7 = vmax.f32 %v372_v1, %v373_v24  ;;  %v397_v16 = vrot.slane %v396_v25, 2 }
  0x63   : > { %v360_v8 = vsel %vm359_vm6, %v338_v61, %v358_v15  ;;  %v380_v10 = vmax.f32 %v378_v3, %v379_v5  ;;  %v386_v17 = vmax.f32 %v384_v4, %v385_v14  ;;  %v392_v18 = vmax.f32 %v390_v9, %v391_v6 }
  0x64   : > { %v362_v29 = vadd.f32 %v360_v8, %v290_v26  ;;  %v369_v30 = vrot.slane %v368_v28, 1  ;;  %v375_v31 = vrot.slane %v374_v7, 1  ;;  %v398_v11 = vmax.f32 %v396_v25, %v397_v16 }
  0x65   : > { %v381_v19 = vrot.slane %v380_v10, 1  ;;  %v387_v32 = vrot.slane %v386_v17, 1  ;;  %v393_v33 = vrot.slane %v392_v18, 1  ;;  %v402_v34 = vmax.f32 %v1387_v12, %v327_v20 }
  0x66   : > { %363 = vst [vmem:[#allocation2] sm:$0xff] %v362_v29  ;;  %v370_v35 = vmax.f32 %v368_v28, %v369_v30  ;;  %v376_v36 = vmax.f32 %v374_v7, %v375_v31  ;;  %v399_v37 = vrot.slane %v398_v11, 1  ;;  %v408_v38 = vmax.f32 %v1389_v13, %v333_v21 }
  0x67   : > { %v382_v39 = vmax.f32 %v380_v10, %v381_v19  ;;  %v388_v40 = vmax.f32 %v386_v17, %v387_v32  ;;  %v394_v41 = vmax.f32 %v392_v18, %v393_v33  ;;  %v403_v42 = vrot.slane %v402_v34, 2 }
  0x68   : > { %v400_v43 = vmax.f32 %v398_v11, %v399_v37  ;;  %v409_v44 = vrot.slane %v408_v38, 2  ;;  %v421_v45 = vsel %vm347_vm0, %v376_v36, %v370_v35 }
  0x69   : > { %v404_v46 = vmax.f32 %v402_v34, %v403_v42  ;;  %v422_v47 = vsel %vm349_vm1, %v382_v39, %v421_v45 }
  0x6a   : > { %v410_v12 = vmax.f32 %v408_v38, %v409_v44  ;;  %v423_v20 = vsel %vm351_vm2, %v388_v40, %v422_v47 }
  0x6b   : > { %v405_v48 = vrot.slane %v404_v46, 1  ;;  %v424_v49 = vsel %vm353_vm3, %v394_v41, %v423_v20 }
  0x6c   : > { %v411_v50 = vrot.slane %v410_v12, 1  ;;  %v425_v13 = vsel %vm355_vm4, %v400_v43, %v424_v49 }
  0x6d   : > { %v406_v21 = vmax.f32 %v404_v46, %v405_v48 }
  0x6e   : > { %v412_v52 = vmax.f32 %v410_v12, %v411_v50 }
  0x6f   : > { %v426_v53 = vsel %vm357_vm5, %v406_v21, %v425_v13  ;;  %434 = sbr.rel (%p734_p1) target bundleno = 283 (0x11b), region = 56 }
  0x70   : > { %v427_v54 = vsel %vm359_vm6, %v412_v52, %v426_v53 }
  0x71   : > { %v429_v55 = vmax.f32 %v364_v51, %v427_v54 }
  0x73   : > { %430 = vst [vmem:[#allocation3] sm:$0xff] %v429_v55 }
  0x74   : > { %v819_v56 = vld [vmem:[#allocation9 + $0x38] sm:$0xff]  ;;  %v818_v58 = vld [vmem:[#allocation9 + $0x30] sm:$0xff]  ;;  %v817_v60 = vld [vmem:[#allocation9 + $0x28] sm:$0xff] }
  0x75   : > { %v811_v57 = vld [vmem:[#allocation7 + $0x38] sm:$0xff]  ;;  %520 = vmatpush.bf16.msra.mxu0 %v819_v56  ;;  %v810_v59 = vld [vmem:[#allocation7 + $0x30] sm:$0xff]  ;;  %v809_v61 = vld [vmem:[#allocation7 + $0x28] sm:$0xff] }
  0x76   : > { %581 = vmatpush.bf16.msra.mxu1 %v811_v57  ;;  %v816_v62 = vld [vmem:[#allocation9 + $0x20] sm:$0xff]  ;;  %v815_v0 = vld [vmem:[#allocation9 + $0x18] sm:$0xff]  ;;  %v814_v2 = vld [vmem:[#allocation9 + $0x10] sm:$0xff] }
  0x77   : > { %v808_v63 = vld [vmem:[#allocation7 + $0x20] sm:$0xff]  ;;  %v807_v1 = vld [vmem:[#allocation7 + $0x18] sm:$0xff]  ;;  %v806_v3 = vld [vmem:[#allocation7 + $0x10] sm:$0xff] }
  0x78   : > { %v813_v4 = vld [vmem:[#allocation9 + $0x8] sm:$0xff]  ;;  %v435_v22 = vld [vmem:[#allocation2] sm:$0xff]  ;;  %v812_v24 = vld [vmem:[#allocation9] sm:$0xff] }
  0x79   : > { %521 = vmatpush.bf16.msra.mxu0 %v818_v58  ;;  %v805_v9 = vld [vmem:[#allocation7 + $0x8] sm:$0xff]  ;;  %v436_v23 = vmul.f32 0.03125, %v435_v22  ;;  %v804_v25 = vld [vmem:[#allocation7] sm:$0xff]  ;;  %v967_v14 = vld [vmem:[%s1533_s8] ss:$0 sm:$0xff] }
  0x7a   : > { %582 = vmatpush.bf16.msra.mxu1 %v810_v59  ;;  %v438_v26 = vld [vmem:[#allocation3] sm:$0xff] }
  0x7b   : > { %v439_v27 = vpack.c.bf16 %v438_v26, %v438_v26  ;;  %v437_v5 = vpack.c.bf16 %v436_v23, %v436_v23 }
  0x7d   : > { %522 = vmatpush.bf16.msra.mxu0 %v817_v60 }
  0x7e   : > { %583 = vmatpush.bf16.msra.mxu1 %v809_v61 }
  0x81   : > { %523 = vmatpush.bf16.msra.mxu0 %v816_v62 }
  0x82   : > { %584 = vmatpush.bf16.msra.mxu1 %v808_v63 }
  0x85   : > { %524 = vmatpush.bf16.msra.mxu0 %v815_v0 }
  0x86   : > { %585 = vmatpush.bf16.msra.mxu1 %v807_v1 }
  0x89   : > { %525 = vmatpush.bf16.msra.mxu0 %v814_v2 }
  0x8a   : > { %586 = vmatpush.bf16.msra.mxu1 %v806_v3 }
  0x8d   : > { %526 = vmatpush.bf16.msra.mxu0 %v813_v4 }
  0x8e   : > { %587 = vmatpush.bf16.msra.mxu1 %v805_v9 }
  0x91   : > { %527 = vmatpush.bf16.msra.mxu0 %v812_v24 }
  0x92   : > { %588 = vmatpush.bf16.msra.mxu1 %v804_v25 }
  0x94   : > { %528 = vmatmul.bf16.vlgmr.msra.gmra.mxu0 %v439_v27 }
  0x95   : > { %589 = vmatmul.bf16.vlgmr.msra.gmra.mxu1 %v437_v5 }
 0x111   : > { %v529_v6 = vpop.f32.mrf.mxu0 }
 0x112   : > { %v590_v15 = vpop.f32.mrf.mxu1 }
 0x113   : > { %v591_v28 = vadd.f32 %v590_v15, %v529_v6 }
 0x115   : > { %v598_v7 = vadd.f32 %v967_v14, %v591_v28 }
 0x117   : > { %599 = vst [vmem:[%s266_s21] sm:$0xff] %v598_v7 }
 0x119   : > { %v531_v16 = vpop.f32.mrf.mxu0 }
 0x11a   : > { %v592_v8 = vpop.f32.mrf.mxu1 }
 0x11b PF: > { %s1534_s12 = sld [smem:[#allocation16_spill]]  ;;  %s613_s7 = sshll.u32 %s266_s21, 4  ;;  %s614_s7 = int_to_ptr.vmem [resolvable:$true] %s613_s7 }
 0x11c   : > { %s1536_s9 = sld [smem:[#allocation23_spill]]  ;;  %s601_s26 = scalar_lea.sflag [#allocation6], %s264_s3 }
 0x121   : > { %s800_s14 = sshll.u32 %s1534_s12, 3 }
 0x122   : > { %s611_s11 = scalar_lea.hbm %s1536_s9, %s800_s14  ;;  %s1078_s29 = scalar_lea.hbm %s1536_s9, 16 }
 0x123   : > { %s615_s15 = sshll.u32 %s611_s11, 4  ;;  %s616_s15 = int_to_ptr.hbm [resolvable:$true] %s615_s15 }
 0x124   : > { %s1072_s22 = sshra.s32 %s616_s15, 4  ;;  %s1073_s22 = int_to_ptr.hbm [resolvable:$true] %s1072_s22 }
 0x125   : > { %s1074_s30 = scalar_lea.hbm %s1073_s22, 8  ;;  %p1079_p3 = scmp.lt.s32.totalorder %s1073_s22, %s1536_s9 }
 0x126   : > { %p1075_p4 = scmp.ne.s32.totalorder %s1073_s22, %s1074_s30  ;;  %p1080_p5 = scmp.lt.s32.totalorder %s1078_s29, %s1074_s30 }
 0x128   : > { %p1076_p0 = pnand %p1075_p4, %p1288_p6  ;;  %p1081_p7 = por %p1080_p5, %p1079_p3 }
 0x12a   : > { %p1077_p2 = pneg %p1076_p0 }
 0x12c   : > { %p1082_p8 = pnand %p1081_p7, %p1077_p2 }
 0x12e   : > { %1085 = shalt.err (!%p1082_p8)
}
 0x12f   : > { %849 = dma.vmem_to_hbm [thread:$0]  (%p1288_p6), %s614_s7, 128, %s616_s15, %s601_s26  }
 0x130 PF: > { %s1537_s3 = sld [smem:[#allocation14_spill]]  ;;  %p871_p9 = scmp.ge.s32.totalorder %s1184_s25, 2 }
 0x132   : > { %p863_p12 = pnand %p871_p9, %p1294_p10 }
 0x134   : > { %p864_p13 = pneg %p863_p12 }
 0x136   : > { %s627_s21 = sand.u32 1, %s1537_s3  }
 0x137   : > { %s628_s12 = scalar_lea.sflag [#allocation6], %s627_s21 }
 0x138   : > { %1139 = dma.done.wait (%p864_p13), %s628_s12, 128  }
 0x139   : > { %1141 = vsyncadd (%p864_p13), %s628_s12, 4294967168  ;;  %s21_s25 = sadd.s32 1, %s1184_s25   ;;  %s1539_s13 = sld [smem:[#allocation19_spill]] }
 0x13a   : > { %p18_p11 = scmp.ge.s32.totalorder %s21_s25, 10   ;;  %s1540_s15 = smov %s1148_s16 }
 0x13b   : > { %s1541_s16 = smov %s1152_s17  ;;  %s1542_s17 = smov %s1342_s1 }
 0x13c   : > { %s1543_s18 = smov %s1160_s19  ;;  %s1544_s19 = smov %s1164_s20 }
 0x13d   : > { %s1545_s20 = smov %s1345_s2  ;;  %s1546_s21 = smov %s1176_s23 }
 0x13e   : > { %s1547_s22 = smov %s1180_s24  ;;  %s1549_s24 = smov %s1555_s10 }
 0x13f   : > { %s1548_s23 = smov %s1539_s13  ;;  %20 = sbr.rel (!%p18_p11) target bundleno = 15 (0xf), region = 97 }
 0x144   :  { %634 = vsyncpa [#allocation5], 1 }
 0x145   :  { %636 = vsyncpa [#allocation5 + $0x1], 1 }
 0x146   :  { %637 = vsyncpa [#allocation8], 1 }
 0x147   :  { %638 = vsyncpa [#allocation6], 1 }
 0x148   :  { %640 = vsyncpa [#allocation6 + $0x1], 1 }

</bundles_post_ra>
